<compile_context>
chip_gen: v7x
topology: tpu7x:2x2x1
jax: 0.10.0
libtpu: 0.0.40
codegen_flags: <defaults>
</compile_context>

<pallas_src>
import functools

import numpy as np
import jax
import jax.numpy as jnp
from jax.experimental import pallas as pl
from jax.experimental.pallas import tpu as pltpu


def _round_up(x, m):
    return (x + m - 1) // m * m


# ----------------------------- Pallas kernel -------------------------------
def tree_net_kernel(inp_ref, w1t_ref, b1_ref, post_ref, negt_ref, c_ref, out_ref,
                    *, compute_dtype):
    def mm(a, b):
        # Cast operands at the MXU only; accumulate in f32.
        return jnp.dot(a.astype(compute_dtype), b.astype(compute_dtype),
                       preferred_element_type=jnp.float32)

    # fcn1: z = inp @ w1^T + b1       (B_tile, N)
    z = mm(inp_ref[...], w1t_ref[...]) + b1_ref[...]
    t = 10.0 * z

    # Numerically stable softplus pieces (shared log term, EUP-bound, f32):
    #   softplus(t)  = max(t, 0)  + log(1 + exp(-|t|))  = -log(1 - sigmoid(t))
    #   softplus(-t) = max(-t, 0) + log(1 + exp(-|t|))  = -log(sigmoid(t))
    log_term = jnp.log(1.0 + jnp.exp(-jnp.abs(t)))
    sp_pos = jnp.maximum(t, 0.0) + log_term       # -log(1 - x)
    sp_neg = jnp.maximum(-t, 0.0) + log_term      # -log(x)

    # Leaf-path product in log space via two MXU matmuls against the 0/1 masks.
    log_xc = -(mm(sp_pos, post_ref[...]) + mm(sp_neg, negt_ref[...]))   # (B_tile, M)
    x_c = jnp.exp(log_xc)

    # fcn2: weight = c^T, bias = 0  =>  x_c @ c   (lane-dense padded class dim)
    out_ref[...] = mm(x_c, c_ref[...]).astype(out_ref.dtype)


# ------------------------------- wrapper ------------------------------------
def tree_net_forward(inp, w1_t, b1, pos, neg, c, *,
                     batch_tile=128, compute_dtype=jnp.float32):
    B, F = inp.shape
    F2, N = w1_t.shape
    M, C = c.shape
    assert F2 == F and pos.shape == (M, N) and neg.shape == (M, N)

    # Batch tile: multiple of 8 sublanes; pad batch up to a multiple of it.
    TB = min(batch_tile, _round_up(B, 8))
    B_pad = _round_up(B, TB)
    # Lane-dense output: pad class dim to a multiple of 128.
    C_pad = _round_up(C, 128)

    inp_p = jnp.pad(inp, ((0, B_pad - B), (0, 0))) if B_pad != B else inp
    c_p = jnp.pad(c, ((0, 0), (0, C_pad - C))) if C_pad != C else c
    pos_t = pos.T    # (N, M)
    neg_t = neg.T    # (N, M)

    grid = (B_pad // TB,)

    # Explicit VMEM budget (padded tiles, f32, x2 for double-buffering headroom).
    blocks = [(TB, F), (F, N), (1, N), (N, M), (N, M), (M, C_pad), (TB, C_pad),
              (TB, N), (TB, N), (TB, M)]           # last three: kernel intermediates
    est = sum(_round_up(r, 8) * _round_up(l, 128) * 4 for r, l in blocks)
    vmem_limit = int(min(max(4 * est, 8 * 2**20), 96 * 2**20))

    kernel = functools.partial(tree_net_kernel, compute_dtype=compute_dtype)

    out = pl.pallas_call(
        kernel,
        out_shape=jax.ShapeDtypeStruct((B_pad, C_pad), jnp.float32),
        grid=grid,
        in_specs=[
            pl.BlockSpec((TB, F), lambda i: (i, 0)),      # batch-tiled input
            pl.BlockSpec((F, N), lambda i: (0, 0)),       # params: constant index_map,
            pl.BlockSpec((1, N), lambda i: (0, 0)),       #  stay VMEM-resident across
            pl.BlockSpec((N, M), lambda i: (0, 0)),       #  grid steps (no re-DMA)
            pl.BlockSpec((N, M), lambda i: (0, 0)),
            pl.BlockSpec((M, C_pad), lambda i: (0, 0)),
        ],
        out_specs=pl.BlockSpec((TB, C_pad), lambda i: (i, 0)),
        compiler_params=pltpu.CompilerParams(
            dimension_semantics=("parallel",),            # megacore split on v7x
            vmem_limit_bytes=vmem_limit,
        ),
    )(inp_p, w1_t, b1, pos_t, neg_t, c_p)

    return out[:B, :C]


# --------------------------- parameter construction ------------------------
def build_params(f_in, n_nodes, m_leaves, n_class, key):
    # `a`: one (or two) nonzero thresholds per row, deterministic.
    a = np.zeros((n_nodes, f_in), dtype=np.float32)
    for i in range(n_nodes):
        a[i, i % f_in] = 0.1 * (i + 1) - 0.4
        if i % 3 == 0:  # some rows get a second nonzero to exercise "last nonzero wins"
            a[i, (i + 5) % f_in] = 0.05 * (i + 2)

    # change_parameters1 semantics: weight = indicator(a != 0); bias[i] = -a[i, last nonzero j]
    w1 = (a != 0).astype(np.float32)                 # (N, F)
    b1 = np.zeros((n_nodes,), dtype=np.float32)
    for i in range(n_nodes):
        for j in range(f_in):
            if a[i, j] != 0:
                b1[i] = -a[i, j]

    # `b`: tree routing matrix with entries in {-1, 0, 1}
    kb, kc, _ = jax.random.split(key, 3)
    b_mat = np.asarray(jax.random.randint(kb, (m_leaves, n_nodes), -1, 2), dtype=np.int32)
    pos = (b_mat == 1).astype(np.float32)
    neg = (b_mat == -1).astype(np.float32)

    # `c`: leaf -> class weights (fcn2 weight is c^T, bias 0)
    c = np.asarray(jax.random.normal(kc, (m_leaves, n_class)), dtype=np.float32)

    return (
        jnp.asarray(w1.T),                      # (F, N), pre-transposed for the kernel
        jnp.asarray(b1).reshape(1, n_nodes),    # (1, N)
        jnp.asarray(pos),                       # (M, N)
        jnp.asarray(neg),                       # (M, N)
        jnp.asarray(c),                         # (M, C)
        jnp.asarray(b_mat),
    )


# ------------------------------- reference ---------------------------------
def reference(inp, w1_t, b1, b_mat, c):
    # Faithful linear-space product, matching the PyTorch double loop.
    x = jax.nn.sigmoid(10.0 * (inp @ w1_t + b1))
    term = jnp.where(
        b_mat[None, :, :] == 1, 1.0 - x[:, None, :],
        jnp.where(b_mat[None, :, :] == -1, x[:, None, :], 1.0),
    )
    x_c = jnp.prod(term, axis=-1)
    return x_c @ c


if __name__ == "__main__":
    BATCH, F_IN, N_NODES, M_LEAVES, N_CLASS = 8, 16, 8, 8, 4

    key = jax.random.PRNGKey(0)
    k_in, k_params = jax.random.split(key)

    w1_t, b1, pos, neg, c, b_mat = build_params(F_IN, N_NODES, M_LEAVES, N_CLASS, k_params)
    inp = jax.random.normal(k_in, (BATCH, F_IN), dtype=jnp.float32)

    # compute_dtype=jnp.bfloat16 engages the bf16 MXU path on v6e/v7x (f32 accumulate);
    # kept at f32 here so the check against the exact linear-space reference is tight.
    out = tree_net_forward(inp, w1_t, b1, pos, neg, c, compute_dtype=jnp.float32)
    out = jax.block_until_ready(out)

    ref = reference(inp, w1_t, b1, b_mat, c)
    np.testing.assert_allclose(np.asarray(out), np.asarray(ref), rtol=1e-4, atol=1e-5)

    print("KERNEL_OK")
</pallas_src>

<mosaic_0001>
module attributes {stable_mosaic.version = 11 : i64} {
  func.func @tree_net_kernel(%arg0: i32, %arg1: memref<8x16xf32, #tpu.memory_space<vmem>>, %arg2: memref<16x8xf32, #tpu.memory_space<vmem>>, %arg3: memref<1x8xf32, #tpu.memory_space<vmem>>, %arg4: memref<8x8xf32, #tpu.memory_space<vmem>>, %arg5: memref<8x8xf32, #tpu.memory_space<vmem>>, %arg6: memref<8x128xf32, #tpu.memory_space<vmem>>, %arg7: memref<8x128xf32, #tpu.memory_space<vmem>>) attributes {dimension_semantics = [#tpu.dimension_semantics<parallel>], iteration_bounds = array<i64: 1>, scalar_prefetch = 0 : i64, scratch_operands = 0 : i64, tpu.core_type = #tpu.core_type<tc>, window_params = [{transform_indices = @transform_0, window_bounds = array<i64: 8, 16>}, {pipeline_mode = #tpu.pipeline_mode<synchronous>, transform_indices = @transform_1, window_bounds = array<i64: 16, 8>}, {pipeline_mode = #tpu.pipeline_mode<synchronous>, transform_indices = @transform_2, window_bounds = array<i64: 1, 8>}, {pipeline_mode = #tpu.pipeline_mode<synchronous>, transform_indices = @transform_3, window_bounds = array<i64: 8, 8>}, {pipeline_mode = #tpu.pipeline_mode<synchronous>, transform_indices = @transform_4, window_bounds = array<i64: 8, 8>}, {pipeline_mode = #tpu.pipeline_mode<synchronous>, transform_indices = @transform_5, window_bounds = array<i64: 8, 128>}, {transform_indices = @transform_6, window_bounds = array<i64: 8, 128>}]} {
    %c0 = arith.constant 0 : index
    %c0_0 = arith.constant 0 : index
    %0 = vector.load %arg1[%c0, %c0_0] : memref<8x16xf32, #tpu.memory_space<vmem>>, vector<8x16xf32>
    %c0_1 = arith.constant 0 : index
    %c0_2 = arith.constant 0 : index
    %1 = vector.load %arg2[%c0_1, %c0_2] : memref<16x8xf32, #tpu.memory_space<vmem>>, vector<16x8xf32>
    %cst = arith.constant dense<0.000000e+00> : vector<8x8xf32>
    %2 = tpu.matmul %0, %1, %cst {dimension_numbers = #tpu.dot_dimension_numbers<[1], [0], [0], [1], [0, 0, 1, 1], [], []>} : vector<8x16xf32>, vector<16x8xf32>, vector<8x8xf32> -> vector<8x8xf32>
    %c0_3 = arith.constant 0 : index
    %c0_4 = arith.constant 0 : index
    %3 = vector.load %arg3[%c0_3, %c0_4] : memref<1x8xf32, #tpu.memory_space<vmem>>, vector<1x8xf32>
    %4 = vector.broadcast %3 : vector<1x8xf32> to vector<8x8xf32>
    %5 = arith.addf %2, %4 : vector<8x8xf32>
    %cst_5 = arith.constant 1.000000e+01 : f32
    %6 = vector.broadcast %cst_5 : f32 to vector<8x8xf32>
    %7 = arith.mulf %6, %5 : vector<8x8xf32>
    %8 = math.absf %7 : vector<8x8xf32>
    %cst_6 = arith.constant 0.000000e+00 : f32
    %9 = vector.broadcast %cst_6 : f32 to vector<8x8xf32>
    %10 = arith.subf %9, %8 : vector<8x8xf32>
    %11 = math.exp %10 : vector<8x8xf32>
    %cst_7 = arith.constant 1.000000e+00 : f32
    %12 = vector.broadcast %cst_7 : f32 to vector<8x8xf32>
    %13 = arith.addf %12, %11 : vector<8x8xf32>
    %14 = math.log %13 : vector<8x8xf32>
    %cst_8 = arith.constant 0.000000e+00 : f32
    %15 = vector.broadcast %cst_8 : f32 to vector<8x8xf32>
    %16 = arith.maximumf %7, %15 : vector<8x8xf32>
    %17 = arith.addf %16, %14 : vector<8x8xf32>
    %cst_9 = arith.constant 0.000000e+00 : f32
    %18 = vector.broadcast %cst_9 : f32 to vector<8x8xf32>
    %19 = arith.subf %18, %7 : vector<8x8xf32>
    %cst_10 = arith.constant 0.000000e+00 : f32
    %20 = vector.broadcast %cst_10 : f32 to vector<8x8xf32>
    %21 = arith.maximumf %19, %20 : vector<8x8xf32>
    %22 = arith.addf %21, %14 : vector<8x8xf32>
    %c0_11 = arith.constant 0 : index
    %c0_12 = arith.constant 0 : index
    %23 = vector.load %arg4[%c0_11, %c0_12] : memref<8x8xf32, #tpu.memory_space<vmem>>, vector<8x8xf32>
    %cst_13 = arith.constant dense<0.000000e+00> : vector<8x8xf32>
    %24 = tpu.matmul %17, %23, %cst_13 {dimension_numbers = #tpu.dot_dimension_numbers<[1], [0], [0], [1], [0, 0, 1, 1], [], []>} : vector<8x8xf32>, vector<8x8xf32>, vector<8x8xf32> -> vector<8x8xf32>
    %c0_14 = arith.constant 0 : index
    %c0_15 = arith.constant 0 : index
    %25 = vector.load %arg5[%c0_14, %c0_15] : memref<8x8xf32, #tpu.memory_space<vmem>>, vector<8x8xf32>
    %cst_16 = arith.constant dense<0.000000e+00> : vector<8x8xf32>
    %26 = tpu.matmul %22, %25, %cst_16 {dimension_numbers = #tpu.dot_dimension_numbers<[1], [0], [0], [1], [0, 0, 1, 1], [], []>} : vector<8x8xf32>, vector<8x8xf32>, vector<8x8xf32> -> vector<8x8xf32>
    %27 = arith.addf %24, %26 : vector<8x8xf32>
    %cst_17 = arith.constant 0.000000e+00 : f32
    %28 = vector.broadcast %cst_17 : f32 to vector<8x8xf32>
    %29 = arith.subf %28, %27 : vector<8x8xf32>
    %30 = math.exp %29 : vector<8x8xf32>
    %c0_18 = arith.constant 0 : index
    %c0_19 = arith.constant 0 : index
    %31 = vector.load %arg6[%c0_18, %c0_19] : memref<8x128xf32, #tpu.memory_space<vmem>>, vector<8x128xf32>
    %cst_20 = arith.constant dense<0.000000e+00> : vector<8x128xf32>
    %32 = tpu.matmul %30, %31, %cst_20 {dimension_numbers = #tpu.dot_dimension_numbers<[1], [0], [0], [1], [0, 0, 1, 1], [], []>} : vector<8x8xf32>, vector<8x128xf32>, vector<8x128xf32> -> vector<8x128xf32>
    %c0_21 = arith.constant 0 : index
    %c0_22 = arith.constant 0 : index
    %33 = vector.load %arg7[%c0_21, %c0_22] : memref<8x128xf32, #tpu.memory_space<vmem>>, vector<8x128xf32>
    tpu.vector_store %arg7[%c0_21, %c0_22], %32 {strides = array<i32>} : memref<8x128xf32, #tpu.memory_space<vmem>>, vector<8x128xf32>,
    return
  }
  func.func @transform_0(%arg0: i32) -> (i32, i32) {
    %c0_i32 = arith.constant 0 : i32
    %c0_i32_0 = arith.constant 0 : i32
    return %arg0, %c0_i32 : i32, i32
  }
  func.func @transform_1(%arg0: i32) -> (i32, i32) {
    %c0_i32 = arith.constant 0 : i32
    %c0_i32_0 = arith.constant 0 : i32
    %c0_i32_1 = arith.constant 0 : i32
    return %c0_i32, %c0_i32_0 : i32, i32
  }
  func.func @transform_2(%arg0: i32) -> (i32, i32) {
    %c0_i32 = arith.constant 0 : i32
    %c0_i32_0 = arith.constant 0 : i32
    %c0_i32_1 = arith.constant 0 : i32
    return %c0_i32, %c0_i32_0 : i32, i32
  }
  func.func @transform_3(%arg0: i32) -> (i32, i32) {
    %c0_i32 = arith.constant 0 : i32
    %c0_i32_0 = arith.constant 0 : i32
    %c0_i32_1 = arith.constant 0 : i32
    return %c0_i32, %c0_i32_0 : i32, i32
  }
  func.func @transform_4(%arg0: i32) -> (i32, i32) {
    %c0_i32 = arith.constant 0 : i32
    %c0_i32_0 = arith.constant 0 : i32
    %c0_i32_1 = arith.constant 0 : i32
    return %c0_i32, %c0_i32_0 : i32, i32
  }
  func.func @transform_5(%arg0: i32) -> (i32, i32) {
    %c0_i32 = arith.constant 0 : i32
    %c0_i32_0 = arith.constant 0 : i32
    %c0_i32_1 = arith.constant 0 : i32
    return %c0_i32, %c0_i32_0 : i32, i32
  }
  func.func @transform_6(%arg0: i32) -> (i32, i32) {
    %c0_i32 = arith.constant 0 : i32
    %c0_i32_0 = arith.constant 0 : i32
    return %arg0, %c0_i32 : i32, i32
  }
}

</mosaic_0001>

<bundles_post_ra>
// kernel: tpu_custom_call.1
= control target key start
LH: loop header
LB: loop body
LE: loop exit
PB: predicated region body
PF: predicated region fallthrough
CT: control target
= control target key end

     0   :  { %v437_v2 = vmov 0.0|0.0   ;;  %vm438_vm0 = vmmov 0   ;;  %v439_v4 = vmov 0.0   ;;  %s516_s0 = inlined_call_operand.vmem [shape: f32[8,16], index: 0, kind: input, shape index: {}]   ;;  %s517_s1 = inlined_call_operand.vmem [shape: f32[16,8], index: 1, kind: input, shape index: {}]   ;;  %s518_s2 = inlined_call_operand.vmem [shape: f32[1,8], index: 2, kind: input, shape index: {}]   ;;  %s519_s3 = inlined_call_operand.vmem [shape: f32[8,8], index: 3, kind: input, shape index: {}]   ;;  %s520_s4 = inlined_call_operand.vmem [shape: f32[8,8], index: 4, kind: input, shape index: {}]   ;;  %s521_s5 = inlined_call_operand.vmem [shape: f32[8,128], index: 5, kind: input, shape index: {}]   ;;  %s522_s6 = inlined_call_operand.hbm [shape: f32[8,128], index: 6, kind: output, shape index: {}]  }
   0x1   :  { %v25_v0 = vld [vmem:[%s517_s1] sm:$0xff]  ;;  %v26_v1 = vld [vmem:[%s517_s1 + $0x8] sm:$0xff]  ;;  %398 = vmatprep.subr.bf16.mxu0 %v437_v2  ;;  %380 = vmatprep.mubr.msk.f32.mxu0 %vm438_vm0, %v439_v4 }
   0x2   :  { %v399_v3 = vpack.c.bf16 %v26_v1, %v25_v0 }
   0x3   :  { %11 = vsyncpa [#allocation3], 0  ;;  %383 = vmatprep.subr.mxu1 %v439_v4  ;;  %385 = vmatprep.mubr.msk.f32.mxu1 %vm438_vm0, %v439_v4  ;;  %v24_v5 = vld [vmem:[%s516_s0] sm:$0xff]  ;;  %vm34_vm1 = vcmask 130048   ;;  %vm123_vm2 = vcmask 64512  }
   0x4   :  { %400 = vmatpush3.bf16.msra.mxu0 %v399_v3  ;;  %v122_v6 = vld [vmem:[%s520_s4] sm:$0xff] }
   0x5   :  { %393 = vmatprep.subr.mxu0 %v439_v4  ;;  %384 = vmatpush3.msra.mxu1 %v122_v6  ;;  %v362_v7 = vld [vmem:[%s518_s2] ss:$0 sm:$0xff] }
   0x6   :  { %388 = vmatprep.subr.mxu1 %v439_v4  ;;  %v121_v22 = vld [vmem:[%s519_s3] sm:$0xff]  ;;  %s440_s3 = smov [#allocation2]  }
   0x7   :  { %381 = vmatmul.mubr.msk.f32.vlgmr.msra.gmra.mrb[0].mxu0 %vm34_vm1, %v24_v5  ;;  %v273_v25 = vld [vmem:[%s521_s5] sm:$0xff]  ;;  %s354_s7 = sshll.u32 %s440_s3, 4  ;;  %s355_s7 = int_to_ptr.vmem [resolvable:$true] %s354_s7 }
   0x8   :  { %395 = vmatprep.mubr.msk.f32.mxu0 %vm438_vm0, %v439_v4  ;;  %394 = vmatpush3.msra.mxu0 %v273_v25  ;;  %s413_s8 = scalar_lea.vmem %s355_s7, 128  ;;  %p418_p1 = scmp.lt.s32.totalorder %s355_s7, %s355_s7 }
   0x9   :  { %p414_p0 = scmp.ne.s32.totalorder %s355_s7, %s413_s8  ;;  %p419_p2 = scmp.lt.s32.totalorder %s413_s8, %s413_s8 }
   0xb   :  { %p420_p3 = por %p419_p2, %p418_p1 }
   0xd   :  { %p421_p4 = pnand %p420_p3, %p414_p0 }
  0xda   :  { %v104_v8 = vpop.f32.mrb[0].mxu0 }
  0xdb   :  { %v105_v9 = vadd.f32 %v362_v7, %v104_v8  ;;  %v382_v10 = vpop.f32.mrb[1].mxu0 }
  0xdd   :  { %v108_v11 = vmul.f32 10.0, %v105_v9 }
  0xdf   :  { %v109_v12 = vand.u32 2147483647, %v108_v11  ;;  %v118_v17 = vsub.f32 0.0, %v108_v11  ;;  %v116_v23 = vmax.f32 %v108_v11, 0.0 }
  0xe1   :  { %v110_v13 = vsub.f32 0.0, %v109_v12  ;;  %v119_v20 = vmax.f32 %v118_v17, 0.0 }
  0xe3   :  { %v111_v14 = vmul.f32 1.442695, %v110_v13 }
  0xe5   :  { %407 = vpow2.f32 %v111_v14 }
  0xef   :  { %v408_v15 = vpop.eup %407 }
  0xf0   :  { %v113_v16 = vadd.f32 1.0, %v408_v15 }
  0xf2   :  { %409 = vlog2.f32 %v113_v16 }
  0xfc   :  { %v410_v18 = vpop.eup %409 }
  0xfd   :  { %v115_v19 = vmul.f32 0.6931472, %v410_v18 }
  0xff   :  { %v120_v21 = vadd.f32 %v119_v20, %v115_v19  ;;  %v117_v24 = vadd.f32 %v116_v23, %v115_v19 }
 0x101   :  { %386 = vmatmul.mubr.msk.f32.vlgmr.msra.gmra.mrb[0].mxu1 %vm123_vm2, %v120_v21 }
 0x102   :  { %389 = vmatpush3.msra.mxu1 %v121_v22  ;;  %390 = vmatprep.mubr.msk.f32.mxu1 %vm438_vm0, %v439_v4 }
 0x109   :  { %391 = vmatmul.mubr.msk.f32.vlgmr.msra.gmra.mrb[0].mxu1 %vm123_vm2, %v117_v24 }
 0x1dc   :  { %v266_v26 = vpop.f32.mrb[0].mxu1 }
 0x1dd   :  { %v270_v27 = vsub.f32 0.0, %v266_v26  ;;  %v392_v28 = vpop.f32.mrb[1].mxu1 }
 0x1df   :  { %v271_v29 = vmul.f32 1.442695, %v270_v27 }
 0x1e1   :  { %411 = vpow2.f32 %v271_v29 }
 0x1eb   :  { %v412_v30 = vpop.eup %411 }
 0x1ec   :  { %396 = vmatmul.mubr.msk.f32.vlgmr.msra.gmra.mrb[2].mxu0 %vm123_vm2, %v412_v30 }
 0x2bf   :  { %v343_v31 = vpop.f32.mrb[2].mxu0 }
 0x2c0   :  { %347 = vst [vmem:[#allocation2] sm:$0xff] %v343_v31  ;;  %v397_v32 = vpop.f32.mrb[3].mxu0 }
 0x2c1   :  { %424 = shalt.err (!%p421_p4)
}
 0x2c2   :  { %s425_s10 = scalar_lea.hbm %s522_s6, 128 }
 0x2c3   :  { %p426_p5 = scmp.ne.s32.totalorder %s522_s6, %s425_s10  ;;  %p429_p6 = scmp.lt.u32.totalorder %s425_s10, %s522_s6 }
 0x2c5   :  { %p431_p7 = pnand %p429_p6, %p426_p5 }
 0x2c7   :  { %434 = shalt.err (!%p431_p7)
}
 0x2c8   :  { %357 = dma.vmem_to_hbm [thread:$0]  %s355_s7, 128, %s522_s6, [#allocation3]  }
 0x2c9   :  { %435 = dma.done.wait [#allocation3], 128  }
 0x2ca   :  { %436 = vsyncadd [#allocation3], 4294967168 }
 0x2cb   :  { %361 = vsyncpa [#allocation3], 1 }

</bundles_post_ra>
